<compile_context>
chip_gen: v5e
topology: v5e:2x2
jax: 0.10.0
libtpu: 0.0.40
codegen_flags: <defaults>
</compile_context>

<pallas_src>
import jax
import jax.numpy as jnp
from jax.experimental import pallas as pl
from jax.experimental.pallas import tpu as pltpu


def _leaky_relu(x, slope=0.1):
    return jnp.where(x >= 0, x, slope * x)


def sft_kernel(x_ref, sft_ref, same_ref,
               w0_ref, b0_ref,
               ws1_ref, bs1_ref,
               wh1_ref, bh1_ref,
               out_ref):
    # x_ref:    (C,  TP)  spatial features (channels on sublane, pixels on lane)
    # sft_ref:  (Ch, TP)  features to be modulated
    # same_ref: (Ch, TP)  pass-through features (first half of the output)
    # w0_ref:   (2C, C)   fused [scale_conv0; shift_conv0] weights, bf16
    # ws1/wh1:  (Ch, C)   second-stage weights, bf16
    # b0/bs1/bh1: (2C,1)/(Ch,1)/(Ch,1) biases, f32
    # out_ref:  (C,  TP)  = concat([out_same, modulated sft], channel axis)
    C = ws1_ref.shape[1]
    Ch = ws1_ref.shape[0]

    x = x_ref[...].astype(jnp.bfloat16)

    # Fused conv0 for both branches: one MXU matmul with shared RHS x.
    hg = jnp.dot(w0_ref[...], x, preferred_element_type=jnp.float32) + b0_ref[...]
    hg = _leaky_relu(hg, 0.1)

    h = hg[:C, :].astype(jnp.bfloat16)   # scale-branch hidden
    g = hg[C:, :].astype(jnp.bfloat16)   # shift-branch hidden

    scale = jnp.dot(ws1_ref[...], h, preferred_element_type=jnp.float32) + bs1_ref[...]
    shift = jnp.dot(wh1_ref[...], g, preferred_element_type=jnp.float32) + bh1_ref[...]

    # torch.cat([out_same, out_sft], dim=1) folded into the store.
    out_ref[:Ch, :] = same_ref[...]
    out_ref[Ch:, :] = (sft_ref[...] * (scale + 1.0) + shift).astype(out_ref.dtype)


def _pick_tile_p(hw, max_tile=2048):
    """Largest pixel tile: full extent if it fits, else a multiple of 128 dividing hw."""
    if hw <= max_tile:
        return hw                      # full-dim block (exempt from the 128 rule)
    t = (max_tile // 128) * 128
    while t >= 128:
        if hw % t == 0:
            return t
        t -= 128
    return hw                          # fallback: whole extent as one block


def sft_layer1_pallas(out_spatial, out_sft, out_same, params, *, max_tile_p=2048):
    """out_spatial: (N, C, H, W); out_sft, out_same: (N, C//2, H, W) -> (N, C, H, W)."""
    N, C, H, W = out_spatial.shape
    Ch = C // 2
    HW = H * W
    tile_p = _pick_tile_p(HW, max_tile_p)
    assert HW % tile_p == 0

    # NCHW -> (N, C, HW): pure reshape, no transpose / HBM round-trip.
    x = out_spatial.reshape(N, C, HW)
    sft = out_sft.reshape(N, Ch, HW)
    same = out_same.reshape(N, Ch, HW)

    def prep(w):  # Conv2d(k=1) weight (O, I, 1, 1) -> (O, I) in bf16 for the MXU
        return w[:, :, 0, 0].astype(jnp.bfloat16)

    # Fused first-stage weights / biases (scale branch stacked above shift branch).
    w0 = jnp.concatenate([prep(params["scale_conv0_w"]),
                          prep(params["shift_conv0_w"])], axis=0)        # (2C, C)
    b0 = jnp.concatenate([params["scale_conv0_b"],
                          params["shift_conv0_b"]], axis=0)[:, None]     # (2C, 1)
    ws1 = prep(params["scale_conv1_w"])                                  # (Ch, C)
    bs1 = params["scale_conv1_b"][:, None]                               # (Ch, 1)
    wh1 = prep(params["shift_conv1_w"])                                  # (Ch, C)
    bh1 = params["shift_conv1_b"][:, None]                               # (Ch, 1)

    grid = (N, HW // tile_p)

    def fixed(shape):
        # Grid-invariant (weight/bias) block: whole array, same block every step.
        return pl.BlockSpec(shape, lambda n, p: tuple(0 for _ in shape))

    P = N * HW
    flops = 4 * P * C * (C + Ch)                       # two fused matmul stages
    bytes_accessed = (P * (2 * C + 2 * Ch)) * 4 \
        + (w0.size + ws1.size + wh1.size) * 2 \
        + (b0.size + bs1.size + bh1.size) * 4

    out_flat = pl.pallas_call(
        sft_kernel,
        out_shape=jax.ShapeDtypeStruct((N, C, HW), out_sft.dtype),
        grid_spec=pl.GridSpec(
            grid=grid,
            in_specs=[
                pl.BlockSpec((None, C, tile_p), lambda n, p: (n, 0, p)),    # x
                pl.BlockSpec((None, Ch, tile_p), lambda n, p: (n, 0, p)),   # sft
                pl.BlockSpec((None, Ch, tile_p), lambda n, p: (n, 0, p)),   # same
                fixed((2 * C, C)), fixed((2 * C, 1)),                        # fused conv0
                fixed((Ch, C)),    fixed((Ch, 1)),                           # scale conv1
                fixed((Ch, C)),    fixed((Ch, 1)),                           # shift conv1
            ],
            out_specs=pl.BlockSpec((None, C, tile_p), lambda n, p: (n, 0, p)),
        ),
        compiler_params=pltpu.CompilerParams(
            dimension_semantics=("parallel", "parallel")),
        cost_estimate=pl.CostEstimate(flops=flops, transcendentals=0,
                                      bytes_accessed=bytes_accessed),
    )(x, sft, same, w0, b0, ws1, bs1, wh1, bh1)

    # (N, C, HW) -> NCHW (free view).
    return out_flat.reshape(N, C, H, W)


def _reference(out_spatial, out_sft, out_same, params):
    """Pure-JAX f32 reference mirroring the PyTorch forward."""
    def conv1x1(x, w, b):  # x: NCHW, w: (O, I, 1, 1)
        y = jnp.einsum("nchw,oc->nohw", x, w[:, :, 0, 0])
        return y + b[None, :, None, None]

    def lrelu(x):
        return jnp.where(x >= 0, x, 0.1 * x)

    scale = conv1x1(lrelu(conv1x1(out_spatial,
                                  params["scale_conv0_w"], params["scale_conv0_b"])),
                    params["scale_conv1_w"], params["scale_conv1_b"])
    shift = conv1x1(lrelu(conv1x1(out_spatial,
                                  params["shift_conv0_w"], params["shift_conv0_b"])),
                    params["shift_conv1_w"], params["shift_conv1_b"])
    sft = out_sft * (scale + 1.0) + shift
    return jnp.concatenate([out_same, sft], axis=1)


def init_params(key, in_features):
    C, Ch = in_features, in_features // 2
    ks = jax.random.split(key, 8)
    s = 0.05
    return {
        "scale_conv0_w": s * jax.random.normal(ks[0], (C, C, 1, 1), jnp.float32),
        "scale_conv0_b": s * jax.random.normal(ks[1], (C,), jnp.float32),
        "scale_conv1_w": s * jax.random.normal(ks[2], (Ch, C, 1, 1), jnp.float32),
        "scale_conv1_b": s * jax.random.normal(ks[3], (Ch,), jnp.float32),
        "shift_conv0_w": s * jax.random.normal(ks[4], (C, C, 1, 1), jnp.float32),
        "shift_conv0_b": s * jax.random.normal(ks[5], (C,), jnp.float32),
        "shift_conv1_w": s * jax.random.normal(ks[6], (Ch, C, 1, 1), jnp.float32),
        "shift_conv1_b": s * jax.random.normal(ks[7], (Ch,), jnp.float32),
    }


if __name__ == "__main__":
    # Small shapes consistent with the module (in_features must be even).
    N, C, H, W = 2, 32, 16, 16
    Ch = C // 2

    key = jax.random.PRNGKey(0)
    k_sp, k_sft, k_same, k_par = jax.random.split(key, 4)

    out_spatial = jax.random.normal(k_sp, (N, C, H, W), jnp.float32)
    out_sft = jax.random.normal(k_sft, (N, Ch, H, W), jnp.float32)
    out_same = jax.random.normal(k_same, (N, Ch, H, W), jnp.float32)
    params = init_params(k_par, C)

    out = sft_layer1_pallas(out_spatial, out_sft, out_same, params)
    out = jax.block_until_ready(out)

    ref = _reference(out_spatial, out_sft, out_same, params)
    assert out.shape == (N, C, H, W)
    # bf16 matmul operands with f32 accumulation: loosen tolerance vs f32 reference.
    assert jnp.allclose(out, ref, atol=2e-2, rtol=2e-2), \
        float(jnp.max(jnp.abs(out - ref)))

    print("KERNEL_OK")
</pallas_src>

<mosaic_0001>
module attributes {stable_mosaic.version = 11 : i64} {
  func.func @sft_kernel(%arg0: i32, %arg1: i32, %arg2: memref<1x32x256xf32, #tpu.memory_space<vmem>>, %arg3: memref<1x16x256xf32, #tpu.memory_space<vmem>>, %arg4: memref<1x16x256xf32, #tpu.memory_space<vmem>>, %arg5: memref<64x32xbf16, #tpu.memory_space<vmem>>, %arg6: memref<64x1xf32, #tpu.memory_space<vmem>>, %arg7: memref<16x32xbf16, #tpu.memory_space<vmem>>, %arg8: memref<16x1xf32, #tpu.memory_space<vmem>>, %arg9: memref<16x32xbf16, #tpu.memory_space<vmem>>, %arg10: memref<16x1xf32, #tpu.memory_space<vmem>>, %arg11: memref<1x32x256xf32, #tpu.memory_space<vmem>>) attributes {dimension_semantics = [#tpu.dimension_semantics<parallel>, #tpu.dimension_semantics<parallel>], iteration_bounds = array<i64: 2, 1>, scalar_prefetch = 0 : i64, scratch_operands = 0 : i64, tpu.core_type = #tpu.core_type<tc>, window_params = [{transform_indices = @transform_0, window_bounds = array<i64: 1, 32, 256>}, {transform_indices = @transform_1, window_bounds = array<i64: 1, 16, 256>}, {transform_indices = @transform_2, window_bounds = array<i64: 1, 16, 256>}, {pipeline_mode = #tpu.pipeline_mode<synchronous>, transform_indices = @transform_3, window_bounds = array<i64: 64, 32>}, {pipeline_mode = #tpu.pipeline_mode<synchronous>, transform_indices = @transform_4, window_bounds = array<i64: 64, 1>}, {pipeline_mode = #tpu.pipeline_mode<synchronous>, transform_indices = @transform_5, window_bounds = array<i64: 16, 32>}, {pipeline_mode = #tpu.pipeline_mode<synchronous>, transform_indices = @transform_6, window_bounds = array<i64: 16, 1>}, {pipeline_mode = #tpu.pipeline_mode<synchronous>, transform_indices = @transform_7, window_bounds = array<i64: 16, 32>}, {pipeline_mode = #tpu.pipeline_mode<synchronous>, transform_indices = @transform_8, window_bounds = array<i64: 16, 1>}, {transform_indices = @transform_9, window_bounds = array<i64: 1, 32, 256>}]} {
    %c0 = arith.constant 0 : index
    %c0_0 = arith.constant 0 : index
    %c0_1 = arith.constant 0 : index
    %0 = vector.load %arg2[%c0, %c0_0, %c0_1] : memref<1x32x256xf32, #tpu.memory_space<vmem>>, vector<1x32x256xf32>
    %1 = vector.shape_cast %0 : vector<1x32x256xf32> to vector<32x256xf32>
    %2 = arith.truncf %1 : vector<32x256xf32> to vector<32x256xbf16>
    %c0_2 = arith.constant 0 : index
    %c0_3 = arith.constant 0 : index
    %3 = vector.load %arg5[%c0_2, %c0_3] : memref<64x32xbf16, #tpu.memory_space<vmem>>, vector<64x32xbf16>
    %cst = arith.constant dense<0.000000e+00> : vector<64x256xf32>
    %4 = tpu.matmul %3, %2, %cst {dimension_numbers = #tpu.dot_dimension_numbers<[1], [0], [0], [1], [0, 0, 1, 1], [], []>} : vector<64x32xbf16>, vector<32x256xbf16>, vector<64x256xf32> -> vector<64x256xf32>
    %c0_4 = arith.constant 0 : index
    %c0_5 = arith.constant 0 : index
    %5 = vector.load %arg6[%c0_4, %c0_5] : memref<64x1xf32, #tpu.memory_space<vmem>>, vector<64x1xf32>
    %6 = vector.broadcast %5 : vector<64x1xf32> to vector<64x256xf32>
    %7 = arith.addf %4, %6 : vector<64x256xf32>
    %cst_6 = arith.constant 0.000000e+00 : f32
    %8 = vector.broadcast %cst_6 : f32 to vector<64x256xf32>
    %9 = arith.cmpf oge, %7, %8 : vector<64x256xf32>
    %cst_7 = arith.constant 1.000000e-01 : f32
    %10 = vector.broadcast %cst_7 : f32 to vector<64x256xf32>
    %11 = arith.mulf %10, %7 : vector<64x256xf32>
    %12 = arith.select %9, %7, %11 : vector<64x256xi1>, vector<64x256xf32>
    %13 = vector.extract_strided_slice %12 {offsets = [0, 0], sizes = [32, 256], strides = [1, 1]} : vector<64x256xf32> to vector<32x256xf32>
    %14 = arith.truncf %13 : vector<32x256xf32> to vector<32x256xbf16>
    %15 = vector.extract_strided_slice %12 {offsets = [32, 0], sizes = [32, 256], strides = [1, 1]} : vector<64x256xf32> to vector<32x256xf32>
    %16 = arith.truncf %15 : vector<32x256xf32> to vector<32x256xbf16>
    %c0_8 = arith.constant 0 : index
    %c0_9 = arith.constant 0 : index
    %17 = vector.load %arg7[%c0_8, %c0_9] : memref<16x32xbf16, #tpu.memory_space<vmem>>, vector<16x32xbf16>
    %cst_10 = arith.constant dense<0.000000e+00> : vector<16x256xf32>
    %18 = tpu.matmul %17, %14, %cst_10 {dimension_numbers = #tpu.dot_dimension_numbers<[1], [0], [0], [1], [0, 0, 1, 1], [], []>} : vector<16x32xbf16>, vector<32x256xbf16>, vector<16x256xf32> -> vector<16x256xf32>
    %c0_11 = arith.constant 0 : index
    %c0_12 = arith.constant 0 : index
    %19 = vector.load %arg8[%c0_11, %c0_12] : memref<16x1xf32, #tpu.memory_space<vmem>>, vector<16x1xf32>
    %20 = vector.broadcast %19 : vector<16x1xf32> to vector<16x256xf32>
    %21 = arith.addf %18, %20 : vector<16x256xf32>
    %c0_13 = arith.constant 0 : index
    %c0_14 = arith.constant 0 : index
    %22 = vector.load %arg9[%c0_13, %c0_14] : memref<16x32xbf16, #tpu.memory_space<vmem>>, vector<16x32xbf16>
    %cst_15 = arith.constant dense<0.000000e+00> : vector<16x256xf32>
    %23 = tpu.matmul %22, %16, %cst_15 {dimension_numbers = #tpu.dot_dimension_numbers<[1], [0], [0], [1], [0, 0, 1, 1], [], []>} : vector<16x32xbf16>, vector<32x256xbf16>, vector<16x256xf32> -> vector<16x256xf32>
    %c0_16 = arith.constant 0 : index
    %c0_17 = arith.constant 0 : index
    %24 = vector.load %arg10[%c0_16, %c0_17] : memref<16x1xf32, #tpu.memory_space<vmem>>, vector<16x1xf32>
    %25 = vector.broadcast %24 : vector<16x1xf32> to vector<16x256xf32>
    %26 = arith.addf %23, %25 : vector<16x256xf32>
    %c0_18 = arith.constant 0 : index
    %c0_19 = arith.constant 0 : index
    %c0_20 = arith.constant 0 : index
    %27 = vector.load %arg4[%c0_18, %c0_19, %c0_20] : memref<1x16x256xf32, #tpu.memory_space<vmem>>, vector<1x16x256xf32>
    %28 = vector.shape_cast %27 : vector<1x16x256xf32> to vector<16x256xf32>
    %c0_21 = arith.constant 0 : index
    %c0_22 = arith.constant 0 : index
    %c0_23 = arith.constant 0 : index
    %29 = vector.load %arg11[%c0_21, %c0_22, %c0_23] : memref<1x32x256xf32, #tpu.memory_space<vmem>>, vector<1x16x256xf32>
    %30 = vector.shape_cast %29 : vector<1x16x256xf32> to vector<16x256xf32>
    %31 = vector.shape_cast %28 : vector<16x256xf32> to vector<1x16x256xf32>
    tpu.vector_store %arg11[%c0_21, %c0_22, %c0_23], %31 {strides = array<i32>} : memref<1x32x256xf32, #tpu.memory_space<vmem>>, vector<1x16x256xf32>,
    %c0_24 = arith.constant 0 : index
    %c0_25 = arith.constant 0 : index
    %c0_26 = arith.constant 0 : index
    %32 = vector.load %arg3[%c0_24, %c0_25, %c0_26] : memref<1x16x256xf32, #tpu.memory_space<vmem>>, vector<1x16x256xf32>
    %33 = vector.shape_cast %32 : vector<1x16x256xf32> to vector<16x256xf32>
    %cst_27 = arith.constant 1.000000e+00 : f32
    %34 = vector.broadcast %cst_27 : f32 to vector<16x256xf32>
    %35 = arith.addf %21, %34 : vector<16x256xf32>
    %36 = arith.mulf %33, %35 : vector<16x256xf32>
    %37 = arith.addf %36, %26 : vector<16x256xf32>
    %c0_28 = arith.constant 0 : index
    %c16 = arith.constant 16 : index
    %c0_29 = arith.constant 0 : index
    %38 = vector.load %arg11[%c0_28, %c16, %c0_29] : memref<1x32x256xf32, #tpu.memory_space<vmem>>, vector<1x16x256xf32>
    %39 = vector.shape_cast %38 : vector<1x16x256xf32> to vector<16x256xf32>
    %40 = vector.shape_cast %37 : vector<16x256xf32> to vector<1x16x256xf32>
    tpu.vector_store %arg11[%c0_28, %c16, %c0_29], %40 {strides = array<i32>} : memref<1x32x256xf32, #tpu.memory_space<vmem>>, vector<1x16x256xf32>,
    return
  }
  func.func @transform_0(%arg0: i32, %arg1: i32) -> (i32, i32, i32) {
    %c0_i32 = arith.constant 0 : i32
    %c0_i32_0 = arith.constant 0 : i32
    return %arg0, %c0_i32, %arg1 : i32, i32, i32
  }
  func.func @transform_1(%arg0: i32, %arg1: i32) -> (i32, i32, i32) {
    %c0_i32 = arith.constant 0 : i32
    %c0_i32_0 = arith.constant 0 : i32
    return %arg0, %c0_i32, %arg1 : i32, i32, i32
  }
  func.func @transform_2(%arg0: i32, %arg1: i32) -> (i32, i32, i32) {
    %c0_i32 = arith.constant 0 : i32
    %c0_i32_0 = arith.constant 0 : i32
    return %arg0, %c0_i32, %arg1 : i32, i32, i32
  }
  func.func @transform_3(%arg0: i32, %arg1: i32) -> (i32, i32) {
    %c0_i32 = arith.constant 0 : i32
    %c0_i32_0 = arith.constant 0 : i32
    %c0_i32_1 = arith.constant 0 : i32
    return %c0_i32, %c0_i32_0 : i32, i32
  }
  func.func @transform_4(%arg0: i32, %arg1: i32) -> (i32, i32) {
    %c0_i32 = arith.constant 0 : i32
    %c0_i32_0 = arith.constant 0 : i32
    %c0_i32_1 = arith.constant 0 : i32
    return %c0_i32, %c0_i32_0 : i32, i32
  }
  func.func @transform_5(%arg0: i32, %arg1: i32) -> (i32, i32) {
    %c0_i32 = arith.constant 0 : i32
    %c0_i32_0 = arith.constant 0 : i32
    %c0_i32_1 = arith.constant 0 : i32
    return %c0_i32, %c0_i32_0 : i32, i32
  }
  func.func @transform_6(%arg0: i32, %arg1: i32) -> (i32, i32) {
    %c0_i32 = arith.constant 0 : i32
    %c0_i32_0 = arith.constant 0 : i32
    %c0_i32_1 = arith.constant 0 : i32
    return %c0_i32, %c0_i32_0 : i32, i32
  }
  func.func @transform_7(%arg0: i32, %arg1: i32) -> (i32, i32) {
    %c0_i32 = arith.constant 0 : i32
    %c0_i32_0 = arith.constant 0 : i32
    %c0_i32_1 = arith.constant 0 : i32
    return %c0_i32, %c0_i32_0 : i32, i32
  }
  func.func @transform_8(%arg0: i32, %arg1: i32) -> (i32, i32) {
    %c0_i32 = arith.constant 0 : i32
    %c0_i32_0 = arith.constant 0 : i32
    %c0_i32_1 = arith.constant 0 : i32
    return %c0_i32, %c0_i32_0 : i32, i32
  }
  func.func @transform_9(%arg0: i32, %arg1: i32) -> (i32, i32, i32) {
    %c0_i32 = arith.constant 0 : i32
    %c0_i32_0 = arith.constant 0 : i32
    return %arg0, %c0_i32, %arg1 : i32, i32, i32
  }
}

</mosaic_0001>

<bundles_post_ra>
// kernel: tpu_custom_call.1
= control target key start
LH: loop header
LB: loop body
LE: loop exit
PB: predicated region body
PF: predicated region fallthrough
CT: control target
= control target key end

     0   :  { %s1626_s0 = inlined_call_operand.vmem [shape: f32[2,32,256], index: 0, kind: input, shape index: {}]   ;;  %s1627_s1 = inlined_call_operand.hbm [shape: f32[2,16,256], index: 1, kind: input, shape index: {}]   ;;  %s1628_s2 = inlined_call_operand.hbm [shape: f32[2,16,256], index: 2, kind: input, shape index: {}]   ;;  %s1629_s3 = inlined_call_operand.vmem [shape: bf16[64,32], index: 3, kind: input, shape index: {}]   ;;  %s1630_s4 = inlined_call_operand.vmem [shape: f32[64,1], index: 4, kind: input, shape index: {}]   ;;  %s1631_s5 = inlined_call_operand.hbm [shape: bf16[16,32], index: 5, kind: input, shape index: {}]   ;;  %s1632_s6 = inlined_call_operand.vmem [shape: f32[16,1], index: 6, kind: input, shape index: {}]   ;;  %s1633_s7 = inlined_call_operand.vmem [shape: bf16[16,32], index: 7, kind: input, shape index: {}]   ;;  %s1634_s8 = inlined_call_operand.vmem [shape: f32[16,1], index: 8, kind: input, shape index: {}]   ;;  %s1635_s9 = inlined_call_operand.hbm [shape: f32[2,32,256], index: 9, kind: output, shape index: {}]  }
   0x1   :  { %1644 = sst [smem:[#allocation20_spill]] %s1631_s5 }
   0x2   :  { %1645 = sst [smem:[#allocation21_spill]] %s1633_s7 }
   0x3   :  { %1646 = sst [smem:[#allocation22_spill]] %s1635_s9 }
   0x4   :  { %14 = vsyncpa [#allocation3], 0 }
   0x5   :  { %16 = vsyncpa [#allocation3 + $0x1], 0 }
   0x6   :  { %17 = vsyncpa [#allocation6], 0 }
   0x7   :  { %19 = vsyncpa [#allocation6 + $0x1], 0 }
   0x8   :  { %20 = vsyncpa [#allocation4], 0 }
   0x9   :  { %22 = vsyncpa [#allocation4 + $0x1], 0  ;;  %s1375_s30 = smov 0   ;;  %s1377_s10 = smov 0  }
   0xa   :  { %s1379_s11 = smov 0   ;;  %s1381_s12 = smov 0  }
   0xb   :  { %s1383_s13 = smov 0   ;;  %s1385_s14 = smov 0  }
   0xc LB: > { %1647 = sst [smem:[#allocation13_spill]] %s1295_s30  ;;  %s1406_s15 = sadd.s32 4294967295, %s1315_s14   ;;  %s1315_s14 = sphi %s1385_s14, %s28_s14   ;;  %s1311_s13 = sphi %s1383_s13, %s1668_s13   ;;  %s1307_s12 = sphi %s1381_s12, %s1667_s12   ;;  %s1303_s11 = sphi %s1379_s11, %s1666_s11   ;;  %s1299_s10 = sphi %s1377_s10, %s1670_s10   ;;  %s1295_s30 = sphi %s1375_s30, %s1669_s30  }
   0xd   : > { %1648 = sst [smem:[#allocation14_spill]] %s1303_s11  ;;  %s975_s16 = sadd.s32 4294967294, %s1315_s14  }
   0xe   : > { %1649 = sst [smem:[#allocation15_spill]] %s1311_s13  ;;  %p90_p0 = scmp.ne.s32.totalorder %s1299_s10, %s1295_s30 }
   0xf   : > { %p91_p1 = scmp.eq.s32.totalorder %s1406_s15, 0  ;;  %p270_p2 = scmp.eq.s32.totalorder %s1406_s15, 1 }
  0x10   : > { %p276_p3 = scmp.eq.s32.totalorder %s975_s16, 1  ;;  %p976_p5 = scmp.ge.s32.totalorder %s1315_s14, 1 }
  0x11   : > { %p1415_p4 = por %p91_p1, %p90_p0  ;;  %p283_p7 = scmp.lt.s32.totalorder %s1315_s14, 3 }
  0x12   : > { %p1420_p6 = por %p276_p3, %p90_p0  ;;  %s1653_s5 = sld [smem:[#allocation20_spill]] }
  0x13   : > { %p1428_p8 = pnand %p976_p5, %p283_p7  ;;  %s1317_s23 = smov [#allocation7]  }
  0x14   : > { %s1651_s18 = scalar_select %p1420_p6, 1, 0 }
  0x15   : > { %p1057_p9 = pneg %p1428_p8  ;;  %s302_s24 = sshll.u32 %s1317_s23, 4  ;;  %s303_s24 = int_to_ptr.vmem [resolvable:$true] %s302_s24 }
  0x16   : > { %1652 = sst [smem:[#allocation16_spill]] %s1651_s18  ;;  %p978_p11 = scmp.ge.s32.totalorder %s1315_s14, 2 }
  0x17   : > { %p1058_p10 = pnand %p1057_p9, %p91_p1  ;;  %s1318_s25 = smov 64  }
  0x18   : > { %s300_s21 = sshll.u32 %s1653_s5, 4  ;;  %s1319_s26 = smov 4   ;;  %s301_s21 = int_to_ptr.hbm [resolvable:$true] %s300_s21 }
  0x19   : > { %1060 = dma.hbm_to_vmem [thread:$0]  (!%p1058_p10), %s301_s21, 128, %s303_s24, [#allocation6], %s1318_s25, %s1318_s25, %s1319_s26  }
  0x1a   : > { %s40_s27 = sadd.s32 1, %s1311_s13  ;;  %s77_s28 = sadd.s32 1, %s1303_s11 }
  0x1b   : > { %p42_p12 = scmp.ge.s32.totalorder %s40_s27, 2  ;;  %p84_p13 = scmp.ne.s32.totalorder %s1303_s11, %s1299_s10 }
  0x1c   : > { %p85_p0 = scmp.eq.s32.totalorder %s1315_s14, 0  ;;  %p1073_p7 = scmp.lt.s32.totalorder %s1315_s14, 2 }
  0x1d   : > { %s1672_s27 = smov (%p42_p12, %s40_s27), 0  ;;  %p1450_p5 = por %p270_p2, %p84_p13 }
  0x1e   : > { %1655 = sst [smem:[#allocation17_spill]] %s1672_s27  ;;  %p1444_p3 = por %p85_p0, %p84_p13 }
  0x1f   : > { %s1657_s16 = scalar_select %p1450_p5, 1, 0 }
  0x20   : > { %s72_s19 = ssub.s32 %s1311_s13, %s1672_s27  ;;  %s338_s20 = sand.u32 1, %s1303_s11  }
  0x21   : > { %1658 = sst [smem:[#allocation18_spill]] %s1657_s16  ;;  %p75_p9 = scmp.eq.s32.totalorder %s72_s19, 0 }
  0x22   : > { %s979_s21 = sshll.u32 %s338_s20, 5  ;;  %s1033_s24 = sshll.u32 %s1311_s13, 5 }
  0x23   : > { %s1459_s23 = scalar_select %p75_p9, %s1303_s11, %s77_s28  }
  0x24   : > { %s349_s5 = scalar_lea.hbm %s1627_s1, %s1033_s24  ;;  %s342_s18 = scalar_lea.vmem [#allocation2], %s979_s21 }
  0x25   : > { %1659 = sst [smem:[#allocation19_spill]] %s1459_s23  ;;  %s352_s30 = sshll.u32 %s342_s18, 4  ;;  %s353_s30 = int_to_ptr.vmem [resolvable:$true] %s352_s30 }
  0x26   : > { %s350_s9 = sshll.u32 %s349_s5, 4  ;;  %p1062_p2 = pnand %p1073_p7, %p1444_p3  ;;  %s351_s9 = int_to_ptr.hbm [resolvable:$true] %s350_s9 }
  0x27   : > { %s339_s27 = scalar_lea.sflag [#allocation3], %s338_s20  ;;  %s1320_s16 = smov 256  }
  0x28   : > { %s1321_s19 = smov 16   ;;  %s373_s13 = scalar_lea.hbm %s1628_s2, %s1033_s24 }
  0x29   : > { %1064 = dma.hbm_to_vmem [thread:$0]  (!%p1062_p2), %s351_s9, 512, %s353_s30, %s339_s27, %s1320_s16, %s1320_s16, %s1321_s19  }
  0x2a   : > { %s366_s23 = scalar_lea.vmem [#allocation5], %s979_s21  ;;  %s374_s25 = sshll.u32 %s373_s13, 4  ;;  %s375_s25 = int_to_ptr.hbm [resolvable:$true] %s374_s25 }
  0x2b   : > { %s376_s11 = sshll.u32 %s366_s23, 4  ;;  %s362_s26 = sand.u32 1, %s1315_s14   ;;  %s377_s11 = int_to_ptr.vmem [resolvable:$true] %s376_s11 }
  0x2c   : > { %s363_s18 = scalar_lea.sflag [#allocation6], %s362_s26  ;;  %388 = sbr.rel (%p1428_p8) target bundleno = 400 (0x190), region = 56 }
  0x2d   : > { %1067 = dma.hbm_to_vmem [thread:$0]  (!%p1062_p2), %s375_s25, 512, %s377_s11, %s363_s18, %s1320_s16, %s1320_s16, %s1321_s19  }
  0x2e   : > { %s1474_s5 = sand.u32 (!%p1428_p8), 1, %s1299_s10  }
  0x2f   : > { %s986_s9 = sshll.u32 (!%p1428_p8), %s1474_s5, 5  ;;  %s391_s7 = scalar_lea.sflag (!%p1428_p8), [#allocation3], %s1474_s5 }
  0x30   : > { %s1478_s30 = scalar_lea.vmem (!%p1428_p8), [#allocation2], %s986_s9 }
  0x31   : > { %1278 = dma.done.wait (%p1415_p4), %s391_s7, 512  }
  0x32   : > { %1280 = vsyncadd (%p1415_p4), %s391_s7, 4294966784  ;;  %s400_s11 = sand.u32 1, %s1406_s15   ;;  %s1485_s22 = scalar_lea.vmem [#allocation5], %s986_s9 }
  0x33   : > { %s401_s13 = scalar_lea.sflag [#allocation6], %s400_s11 }
  0x34   : > { %1282 = dma.done.wait (%p1415_p4), %s401_s13, 512  }
  0x35   : > { %1284 = vsyncadd (%p1415_p4), %s401_s13, 4294966784 }
  0x36   : > { %1286 = dma.done.wait (%p91_p1), [#allocation6], 128  }
  0x37   : > { %1288 = vsyncadd (%p91_p1), [#allocation6], 4294967168  ;;  %p460_p8 = scmp.lt.s32.totalorder %s1307_s12, 1  ;;  %v1322_v0 = vmov 0   ;;  %v495_v12 = vld [vmem:[%s1630_s4 + $0x10] sm:$0xff]  ;;  %v493_v13 = vld [vmem:[%s1630_s4] sm:$0xff] }
  0x38   : > { %1132 = vset.pattern.permute.xlu0 %v1322_v0  ;;  %1133 = vset.pattern.permute.xlu1 %v1322_v0  ;;  %v1036_v15 = vld [vmem:[%s1629_s3] sm:$0xff]  ;;  %v1039_v16 = vld [vmem:[%s1629_s3 + $0x18] sm:$0xff]  ;;  %vm561_vm0 = vcmask 261120   ;;  %v494_v18 = vld [vmem:[%s1630_s4 + $0x8] sm:$0xff]  ;;  %s1660_s20 = sld [smem:[#allocation21_spill]]  ;;  %s817_s26 = scalar_lea.sflag [#allocation4], %s1474_s5 }
  0x39   : > { %s461_s27 = scalar_select %p460_p8, %s1307_s12, 1  ;;  %1134 = vset.pattern.permute.xlu2 %v1322_v0  ;;  %513 = vperm.xlu0 %1132, %v495_v12   ;;  %v496_v17 = vld [vmem:[%s1630_s4 + $0x18] sm:$0xff]  ;;  %v499_v19 = vld [vmem:[%s1630_s4 + $0x30] sm:$0xff]  ;;  %v497_v20 = vld [vmem:[%s1630_s4 + $0x20] sm:$0xff] }
  0x3a   : > { %503 = vperm.xlu1 %1133, %v493_v13   ;;  %533 = vperm.xlu2 %1134, %v499_v19   ;;  %v498_v21 = vld [vmem:[%s1630_s4 + $0x28] sm:$0xff]  ;;  %v500_v22 = vld [vmem:[%s1630_s4 + $0x38] sm:$0xff]  ;;  %v740_v25 = vld [vmem:[%s1634_s8] sm:$0xff]  ;;  %s1661_s24 = sld [smem:[#allocation22_spill]] }
  0x3b   : > { %s1035_s29 = sshll.u32 %s461_s27, 6  ;;  %v1037_v23 = vld [vmem:[%s1629_s3 + $0x8] sm:$0xff]  ;;  %v690_v26 = vld [vmem:[%s1632_s6] sm:$0xff]  ;;  %v1038_v28 = vld [vmem:[%s1629_s3 + $0x10] sm:$0xff] }
  0x3c   : > { %s467_s17 = scalar_lea.vmem %s1626_s0, %s1035_s29  ;;  %v691_v24 = vld [vmem:[%s1632_s6 + $0x8] sm:$0xff] }
  0x3d   : > { %v477_v1 = vld [vmem:[%s467_s17 + $0x20] sm:$0xff]  ;;  %v479_v2 = vld [vmem:[%s467_s17 + $0x30] sm:$0xff]  ;;  %v478_v3 = vld [vmem:[%s467_s17 + $0x28] sm:$0xff] }
  0x3e   : > { %v483_v4 = vpack.c.bf16 %v479_v2, %v477_v1  ;;  %v480_v5 = vld [vmem:[%s467_s17 + $0x38] sm:$0xff]  ;;  %v473_v6 = vld [vmem:[%s467_s17] sm:$0xff]  ;;  %v475_v7 = vld [vmem:[%s467_s17 + $0x10] sm:$0xff] }
  0x3f   : > { %v484_v8 = vpack.c.bf16 %v480_v5, %v478_v3  ;;  %v474_v9 = vld [vmem:[%s467_s17 + $0x8] sm:$0xff]  ;;  %v476_v10 = vld [vmem:[%s467_s17 + $0x18] sm:$0xff]  ;;  %v481_v11 = vpack.c.bf16 %v475_v7, %v473_v6  ;;  %s989_s17 = sshll.u32 %s1474_s5, 6 }
  0x40   : > { %580 = vmatpush.bf16.msra.mxu0 %v483_v4  ;;  %1043 = vmatpush.bf16.msra.mxu2 %v483_v4  ;;  %v482_v14 = vpack.c.bf16 %v476_v10, %v474_v9  ;;  %v741_v27 = vld [vmem:[%s1634_s8 + $0x8] sm:$0xff]  ;;  %s1573_s15 = scalar_lea.vmem [#allocation8], %s989_s17  ;;  %s1245_s11 = scalar_lea.hbm %s1661_s24, 128 }
  0x41   : > { %609 = vmatpush.bf16.msra.mxu1 %v484_v8  ;;  %1045 = vmatpush.bf16.msra.mxu3 %v484_v8  ;;  %s831_s28 = sshll.u32 %s1573_s15, 4  ;;  %s832_s28 = int_to_ptr.vmem [resolvable:$true] %s831_s28 }
  0x42   : > { %518 = vperm.xlu0 %1132, %v496_v17   ;;  %508 = vperm.xlu1 %1133, %v494_v18  }
  0x43   : > { %538 = vperm.xlu2 %1134, %v500_v22  }
  0x44   : > { %581 = vmatpush.bf16.msra.mxu0 %v481_v11  ;;  %1044 = vmatpush.bf16.msra.mxu2 %v481_v11 }
  0x45   : > { %610 = vmatpush.bf16.msra.mxu1 %v482_v14  ;;  %1046 = vmatpush.bf16.msra.mxu3 %v482_v14 }
  0x47   : > { %1008 = vmatmul.msk.bf16.vlgmr.msra.gmra.mxu0 %vm561_vm0, %v1036_v15  ;;  %1011 = vmatmul.msk.bf16.vlgmr.msra.gmra.mxu2 %vm561_vm0, %v1039_v16 }
  0x48   : > { %1012 = vmatmul.msk.bf16.vlgmr.msra.gmra.mxu1 %vm561_vm0, %v1036_v15  ;;  %1015 = vmatmul.msk.bf16.vlgmr.msra.gmra.mxu3 %vm561_vm0, %v1039_v16 }
  0x4a   : > { %523 = vperm.xlu0 %1132, %v497_v20   ;;  %528 = vperm.xlu1 %1133, %v498_v21  }
  0x4b   : > { %694 = vperm.xlu2 %1134, %v690_v26  }
  0x52   : > { %699 = vperm.xlu0 %1132, %v691_v24   ;;  %744 = vperm.xlu1 %1133, %v740_v25  }
  0x53   : > { %749 = vperm.xlu2 %1134, %v741_v27   ;;  %v1040_v27 = vld [vmem:[#allocation7] sm:$0xff] }
  0x57   : > { %1009 = vmatmul.msk.bf16.gmra.mxu0 %vm561_vm0, %v1037_v23 }
  0x58   : > { %1013 = vmatmul.msk.bf16.gmra.mxu1 %vm561_vm0, %v1037_v23 }
  0x67   : > { %1010 = vmatmul.msk.bf16.gmra.mxu0 %vm561_vm0, %v1038_v28 }
  0x68   : > { %1014 = vmatmul.msk.bf16.gmra.mxu1 %vm561_vm0, %v1038_v28 }
  0x94   : > { %v534_v35 = vpop.permute.xlu2 %533 }
  0x9d   : > { %v539_v46 = vpop.permute.xlu2 %538 }
  0xab   : > { %v514_v37 = vpop.permute.xlu0 %513 }
  0xac   : > { %v504_v33 = vpop.permute.xlu1 %503 }
  0xb4   : > { %v509_v43 = vpop.permute.xlu1 %508  ;;  %v519_v57 = vpop.permute.xlu0 %518 }
  0xbc   : > { %v524_v28 = vpop.permute.xlu0 %523 }
  0xc4   : > { %v583_v29 = vpop.f32.mrf.mxu0 }
  0xc5   : > { %v612_v30 = vpop.f32.mrf.mxu1  ;;  %v584_v40 = vadd.f32 %v583_v29, %v504_v33 }
  0xc6   : > { %v613_v42 = vadd.f32 %v612_v30, %v504_v33 }
  0xc7   : > { %v648_v52 = vmul.f32 0.1, %v584_v40  ;;  %vm632_vm1 = vcmp.ge.f32.partialorder %v584_v40, 0.0 }
  0xc8   : > { %v649_v54 = vmul.f32 0.1, %v613_v42  ;;  %vm633_vm2 = vcmp.ge.f32.partialorder %v613_v42, 0.0 }
  0xc9   : > { %v664_v22 = vsel %vm632_vm1, %v584_v40, %v648_v52 }
  0xca   : > { %v598_v32 = vpop.f32.mrf.mxu2  ;;  %v665_v25 = vsel %vm633_vm2, %v613_v42, %v649_v54 }
  0xcb   : > { %v627_v36 = vpop.f32.mrf.mxu3  ;;  %v599_v44 = vadd.f32 %v598_v32, %v534_v35 }
  0xcc   : > { %v585_v31 = vpop.f32.mrf.mxu0  ;;  %v628_v47 = vadd.f32 %v627_v36, %v534_v35 }
  0xcd   : > { %v614_v34 = vpop.f32.mrf.mxu1  ;;  %v586_v45 = vadd.f32 %v585_v31, %v509_v43  ;;  %v660_v55 = vmul.f32 0.1, %v599_v44  ;;  %vm644_vm3 = vcmp.ge.f32.partialorder %v599_v44, 0.0  ;;  %v529_v31 = vpop.permute.xlu1 %528 }
  0xce   : > { %v615_v49 = vadd.f32 %v614_v34, %v509_v43  ;;  %vm645_vm4 = vcmp.ge.f32.partialorder %v628_v47, 0.0  ;;  %v661_v59 = vmul.f32 0.1, %v628_v47 }
  0xcf   : > { %v650_v58 = vmul.f32 0.1, %v586_v45  ;;  %vm634_vm11 = vcmp.ge.f32.partialorder %v586_v45, 0.0  ;;  %v676_v7 = vsel %vm644_vm3, %v599_v44, %v660_v55 }
  0xd0   : > { %v651_v61 = vmul.f32 0.1, %v615_v49  ;;  %vm635_vm12 = vcmp.ge.f32.partialorder %v615_v49, 0.0  ;;  %v677_v14 = vsel %vm645_vm4, %v628_v47, %v661_v59  ;;  %v788_v47 = vld [vmem:[%s1485_s22] sm:$0xff] }
  0xd1   : > { %v666_v17 = vsel %vm634_vm11, %v586_v45, %v650_v58  ;;  %792 = vst [vmem:[%s1573_s15] sm:$0xff] %v788_v47  ;;  %v796_v59 = vld [vmem:[%s1478_s30] sm:$0xff] }
  0xd2   : > { %v600_v41 = vpop.f32.mrf.mxu2  ;;  %v667_v19 = vsel %vm635_vm12, %v615_v49, %v651_v61  ;;  %v680_v24 = vpack.c.bf16 %v666_v17, %v664_v22  ;;  %v790_v49 = vld [vmem:[%s1485_s22 + $0x10] sm:$0xff]  ;;  %v700_v61 = vpop.permute.xlu0 %699 }
  0xd3   : > { %v629_v48 = vpop.f32.mrf.mxu3  ;;  %v601_v51 = vadd.f32 %v600_v41, %v539_v46  ;;  %v681_v26 = vpack.c.bf16 %v667_v19, %v665_v25  ;;  %794 = vst [vmem:[%s1573_s15 + $0x10] sm:$0xff] %v790_v49 }
  0xd4   : > { %v588_v38 = vpop.f32.mrf.mxu0  ;;  %v630_v56 = vadd.f32 %v629_v48, %v539_v46  ;;  %v1041_v46 = vld [vmem:[%s1660_s20] sm:$0xff]  ;;  %v789_v48 = vld [vmem:[%s1485_s22 + $0x8] sm:$0xff] }
  0xd5   : > { %v617_v39 = vpop.f32.mrf.mxu1  ;;  %v589_v50 = vadd.f32 %v588_v38, %v514_v37  ;;  %vm646_vm5 = vcmp.ge.f32.partialorder %v601_v51, 0.0  ;;  %v662_v3 = vmul.f32 0.1, %v601_v51  ;;  %793 = vst [vmem:[%s1573_s15 + $0x8] sm:$0xff] %v789_v48 }
  0xd6   : > { %v618_v53 = vadd.f32 %v617_v39, %v514_v37  ;;  %v663_v5 = vmul.f32 0.1, %v630_v56  ;;  %vm647_vm9 = vcmp.ge.f32.partialorder %v630_v56, 0.0 }
  0xd7   : > { %v652_v62 = vmul.f32 0.1, %v589_v50  ;;  %vm636_vm6 = vcmp.ge.f32.partialorder %v589_v50, 0.0  ;;  %v678_v10 = vsel %vm646_vm5, %v601_v51, %v662_v3 }
  0xd8   : > { %v653_v1 = vmul.f32 0.1, %v618_v53  ;;  %vm637_vm8 = vcmp.ge.f32.partialorder %v618_v53, 0.0  ;;  %v679_v15 = vsel %vm647_vm9, %v630_v56, %v663_v5  ;;  %v686_v20 = vpack.c.bf16 %v678_v10, %v676_v7 }
  0xd9   : > { %v668_v8 = vsel %vm636_vm6, %v589_v50, %v652_v62  ;;  %v687_v23 = vpack.c.bf16 %v679_v15, %v677_v14  ;;  %v791_v50 = vld [vmem:[%s1485_s22 + $0x18] sm:$0xff]  ;;  %v797_v62 = vld [vmem:[%s1478_s30 + $0x8] sm:$0xff]  ;;  %s1042_s22 = sshll.u32 %s1307_s12, 6 }
  0xda   : > { %v669_v12 = vsel %vm637_vm8, %v618_v53, %v653_v1  ;;  %795 = vst [vmem:[%s1573_s15 + $0x18] sm:$0xff] %v791_v50  ;;  %v695_v53 = vpop.permute.xlu2 %694  ;;  %s830_s19 = scalar_lea.hbm %s1661_s24, %s1042_s22 }
  0xdb   : > { %s833_s25 = sshll.u32 %s830_s19, 4  ;;  %s834_s25 = int_to_ptr.hbm [resolvable:$true] %s833_s25 }
  0xdc   : > { %v590_v60 = vpop.f32.mrf.mxu0  ;;  %s1239_s18 = sshra.s32 %s834_s25, 4  ;;  %s1240_s18 = int_to_ptr.hbm [resolvable:$true] %s1239_s18 }
  0xdd   : > { %v591_v63 = vadd.f32 %v590_v60, %v519_v57  ;;  %v619_v0 = vpop.f32.mrf.mxu1  ;;  %p1246_p12 = scmp.lt.s32.totalorder %s1240_s18, %s1661_s24 }
  0xde   : > { %v620_v2 = vadd.f32 %v619_v0, %v519_v57 }
  0xdf   : > { %v654_v4 = vmul.f32 0.1, %v591_v63  ;;  %vm638_vm7 = vcmp.ge.f32.partialorder %v591_v63, 0.0 }
  0xe0   : > { %v655_v6 = vmul.f32 0.1, %v620_v2  ;;  %vm639_vm10 = vcmp.ge.f32.partialorder %v620_v2, 0.0 }
  0xe1   : > { %v670_v9 = vsel %vm638_vm7, %v591_v63, %v654_v4  ;;  %v745_v63 = vpop.permute.xlu1 %744 }
  0xe2   : > { %v682_v11 = vpack.c.bf16 %v670_v9, %v668_v8  ;;  %v671_v13 = vsel %vm639_vm10, %v620_v2, %v655_v6  ;;  %v750_v14 = vpop.permute.xlu2 %749 }
  0xe3   : > { %v683_v16 = vpack.c.bf16 %v671_v13, %v669_v12  ;;  %v799_v13 = vld [vmem:[%s1478_s30 + $0x18] sm:$0xff] }
  0xe4   : > { %v593_v18 = vpop.f32.mrf.mxu0  ;;  %716 = vmatpush.bf16.msrb.mxu2 %v682_v11  ;;  %v798_v11 = vld [vmem:[%s1478_s30 + $0x10] sm:$0xff]  ;;  %s1241_s30 = scalar_lea.hbm %s1240_s18, 64 }
  0xe5   : > { %v622_v21 = vpop.f32.mrf.mxu1  ;;  %730 = vmatpush.bf16.msrb.mxu3 %v683_v16  ;;  %v594_v29 = vadd.f32 %v593_v18, %v524_v28  ;;  %p1242_p1 = scmp.ne.s32.totalorder %s1240_s18, %s1241_s30  ;;  %p1247_p13 = scmp.lt.s32.totalorder %s1245_s11, %s1241_s30 }
  0xe6   : > { %v623_v30 = vadd.f32 %v622_v21, %v524_v28 }
  0xe7   : > { %v656_v33 = vmul.f32 0.1, %v594_v29  ;;  %vm640_vm13 = vcmp.ge.f32.partialorder %v594_v29, 0.0  ;;  %p1243_p4 = pnand %p1242_p1, %p1450_p5  ;;  %p1248_p0 = por %p1247_p13, %p1246_p12 }
  0xe8   : > { %717 = vmatpush.bf16.msrb.mxu2 %v680_v24  ;;  %v657_v36 = vmul.f32 0.1, %v623_v30  ;;  %vm641_vm14 = vcmp.ge.f32.partialorder %v623_v30, 0.0 }
  0xe9   : > { %731 = vmatpush.bf16.msrb.mxu3 %v681_v26  ;;  %v672_v40 = vsel %vm640_vm13, %v594_v29, %v656_v33  ;;  %p1244_p10 = pneg %p1243_p4 }
  0xea   : > { %v673_v43 = vsel %vm641_vm14, %v623_v30, %v657_v36 }
  0xeb   : > { %1020 = vmatmul.msk.bf16.vlgmr.msrb.gmra.mxu2 %vm561_vm0, %v1040_v27  ;;  %p1249_p3 = pnand %p1248_p0, %p1244_p10 }
  0xec   : > { %766 = vmatpush.bf16.msra.mxu2 %v686_v20  ;;  %1021 = vmatmul.msk.bf16.vlgmr.msrb.gmra.mxu3 %vm561_vm0, %v1040_v27  ;;  %v595_v32 = vpop.f32.mrf.mxu0 }
  0xed   : > { %780 = vmatpush.bf16.msra.mxu3 %v687_v23  ;;  %v596_v34 = vadd.f32 %v595_v32, %v529_v31  ;;  %v624_v35 = vpop.f32.mrf.mxu1 }
  0xee   : > { %v625_v37 = vadd.f32 %v624_v35, %v529_v31 }
  0xef   : > { %vm642_vm15 = vcmp.ge.f32.partialorder %v596_v34, 0.0  ;;  %v658_v38 = vmul.f32 0.1, %v596_v34 }
  0xf0   : > { %vm643_vm1 = vcmp.ge.f32.partialorder %v625_v37, 0.0  ;;  %v659_v39 = vmul.f32 0.1, %v625_v37 }
  0xf1   : > { %v674_v41 = vsel %vm642_vm15, %v596_v34, %v658_v38 }
  0xf2   : > { %v684_v42 = vpack.c.bf16 %v674_v41, %v672_v40  ;;  %v675_v44 = vsel %vm643_vm1, %v625_v37, %v659_v39 }
  0xf3   : > { %v685_v45 = vpack.c.bf16 %v675_v44, %v673_v43 }
  0xf4   : > { %767 = vmatpush.bf16.msra.mxu2 %v684_v42 }
  0xf5   : > { %781 = vmatpush.bf16.msra.mxu3 %v685_v45 }
  0xfb   : > { %1026 = vmatmul.msk.bf16.vlgmr.msra.gmra.mxu2 %vm561_vm0, %v1041_v46 }
  0xfc   : > { %1027 = vmatmul.msk.bf16.vlgmr.msra.gmra.mxu3 %vm561_vm0, %v1041_v46 }
 0x16e   : > { %v719_v51 = vpop.f32.mrf.mxu2 }
 0x16f   : > { %v733_v52 = vpop.f32.mrf.mxu3  ;;  %v720_v55 = vadd.f32 %v719_v51, %v695_v53 }
 0x170   : > { %v734_v57 = vadd.f32 %v733_v52, %v695_v53 }
 0x171   : > { %v800_v58 = vadd.f32 1.0, %v720_v55 }
 0x172   : > { %v801_v60 = vadd.f32 1.0, %v734_v57 }
 0x173   : > { %v804_v1 = vmul.f32 %v800_v58, %v796_v59 }
 0x174   : > { %v805_v5 = vmul.f32 %v801_v60, %v797_v62 }
 0x176   : > { %v721_v54 = vpop.f32.mrf.mxu2 }
 0x177   : > { %v735_v56 = vpop.f32.mrf.mxu3  ;;  %v722_v2 = vadd.f32 %v721_v54, %v700_v61 }
 0x178   : > { %v736_v6 = vadd.f32 %v735_v56, %v700_v61 }
 0x179   : > { %v802_v10 = vadd.f32 1.0, %v722_v2 }
 0x17a   : > { %v803_v12 = vadd.f32 1.0, %v736_v6 }
 0x17b   : > { %v806_v16 = vmul.f32 %v802_v10, %v798_v11 }
 0x17c   : > { %v807_v19 = vmul.f32 %v803_v12, %v799_v13 }
 0x17e   : > { %v769_v0 = vpop.f32.mrf.mxu2 }
 0x17f   : > { %v770_v3 = vadd.f32 %v769_v0, %v745_v63  ;;  %v783_v4 = vpop.f32.mrf.mxu3 }
 0x180   : > { %v784_v7 = vadd.f32 %v783_v4, %v745_v63 }
 0x181   : > { %v808_v8 = vadd.f32 %v804_v1, %v770_v3 }
 0x182   : > { %v809_v9 = vadd.f32 %v805_v5, %v784_v7 }
 0x183   : > { %812 = vst [vmem:[%s1573_s15 + $0x20] sm:$0xff] %v808_v8 }
 0x184   : > { %813 = vst [vmem:[%s1573_s15 + $0x28] sm:$0xff] %v809_v9 }
 0x186   : > { %v771_v15 = vpop.f32.mrf.mxu2 }
 0x187   : > { %v772_v17 = vadd.f32 %v771_v15, %v750_v14  ;;  %v785_v18 = vpop.f32.mrf.mxu3 }
 0x188   : > { %v786_v20 = vadd.f32 %v785_v18, %v750_v14 }
 0x189   : > { %v810_v21 = vadd.f32 %v806_v16, %v772_v17 }
 0x18a   : > { %v811_v22 = vadd.f32 %v807_v19, %v786_v20 }
 0x18b   : > { %814 = vst [vmem:[%s1573_s15 + $0x30] sm:$0xff] %v810_v21 }
 0x18c   : > { %815 = vst [vmem:[%s1573_s15 + $0x38] sm:$0xff] %v811_v22 }
 0x18d   : > { %1252 = shalt.err (!%p1249_p3)
}
 0x18e   : > { %s1323_s5 = smov 256   ;;  %s1324_s29 = smov 16  }
 0x18f   : > { %1055 = dma.vmem_to_hbm [thread:$0]  (%p1450_p5), %s832_s28, 1024, %s834_s25, %s817_s26, %s1323_s5, %s1323_s5, %s1324_s29  }
 0x190 PF: > { %s1663_s16 = sld [smem:[#allocation13_spill]]  ;;  %p1069_p7 = pnand %p978_p11, %p1420_p6 }
 0x192   : > { %p1070_p9 = pneg %p1069_p7 }
 0x196   : > { %s848_s17 = sand.u32 1, %s1663_s16  }
 0x197   : > { %s849_s15 = scalar_lea.sflag [#allocation4], %s848_s17 }
 0x198   : > { %1290 = dma.done.wait (%p1070_p9), %s849_s15, 1024  }
 0x199   : > { %1292 = vsyncadd (%p1070_p9), %s849_s15, 4294966272  ;;  %s28_s14 = sadd.s32 1, %s1315_s14   ;;  %s1665_s22 = sld [smem:[#allocation14_spill]] }
 0x19a   : > { %p25_p2 = scmp.ge.s32.totalorder %s28_s14, 4   ;;  %s1666_s11 = sld [smem:[#allocation19_spill]] }
 0x19b   : > { %s1667_s12 = sld [smem:[#allocation15_spill]]  ;;  %s1669_s30 = smov %s1299_s10 }
 0x19c   : > { %s1668_s13 = sld [smem:[#allocation17_spill]]  ;;  %27 = sbr.rel (!%p25_p2) target bundleno = 12 (0xc), region = 121 }
 0x19f   : > { %s1670_s10 = smov %s1665_s22 }
 0x1a1   :  { %855 = vsyncpa [#allocation3], 1 }
 0x1a2   :  { %857 = vsyncpa [#allocation3 + $0x1], 1 }
 0x1a3   :  { %858 = vsyncpa [#allocation6], 1 }
 0x1a4   :  { %860 = vsyncpa [#allocation6 + $0x1], 1 }
 0x1a5   :  { %861 = vsyncpa [#allocation4], 1 }
 0x1a6   :  { %863 = vsyncpa [#allocation4 + $0x1], 1 }

</bundles_post_ra>
